<compile_context>
chip_gen: v7x
topology: tpu7x:2x2x1
jax: 0.10.0
libtpu: 0.0.40
codegen_flags: <defaults>
</compile_context>

<pallas_src>
import jax
import jax.numpy as jnp
from jax import lax
from jax.experimental import pallas as pl
from jax.experimental.pallas import tpu as pltpu


def _round_up(x, m):
    return ((x + m - 1) // m) * m


def two_tower_triplet_rnn(query_embs, pos_embs, neg_embs,
                          w1_q, b1_q, w1_p, b1_p, *, t_chunk=16):
    """Pallas forward of TwoTowerTripletRNN.

    query_embs / pos_embs / neg_embs : [B, T, E]
    w1_q, w1_p : [E + H, H]   (torch nn.Linear weight, transposed)
    b1_q, b1_p : [H]
    returns (q_vec, p_pos, p_neg), each [B, H]
    """
    B, T, E = query_embs.shape
    assert pos_embs.shape == (B, T, E) and neg_embs.shape == (B, T, E)
    H = b1_q.shape[-1]
    assert w1_q.shape == (E + H, H) and w1_p.shape == (E + H, H)

    # ---------------- tile geometry ----------------
    # Passage stream = pos & neg stacked along batch (shared tower weights);
    # the query stream is padded to the same sublane width M.
    M = _round_up(max(2 * B, 8), 8)          # rows per stream (sublane axis)
    H_pad = _round_up(max(H, 128), 128)      # hidden on the lane axis
    T_CHUNK = max(1, min(t_chunk, T))        # timesteps per grid step
    n_chunks = pl.cdiv(T, T_CHUNK)
    T_pad = n_chunks * T_CHUNK
    has_tail = (T_pad != T)

    # ---------------- input layout: (stream, time-major rows, E) ----------
    # row index inside a stream = t * M + batch_row.
    # TODO(synk): at production scale, produce this [T, M, E] layout upstream
    # (or feed pre-stacked passages) to avoid an extra HBM round trip of the
    # embeddings before the kernel; at these toy shapes it is negligible.
    def _layout(x_bte, rows):                # (rows, T, E) -> (T_pad*M, E)
        x = jnp.transpose(x_bte, (1, 0, 2))                       # (T, rows, E)
        x = jnp.pad(x, ((0, T_pad - T), (0, M - rows), (0, 0)))
        return x.reshape(T_pad * M, E)

    x_query = _layout(query_embs, B)
    x_pass = _layout(jnp.concatenate([pos_embs, neg_embs], axis=0), 2 * B)
    x_all = jnp.stack([x_query, x_pass], axis=0)                  # (2, T_pad*M, E)

    # ---------------- weights: split concat-Linear, pad hidden ------------
    # tanh(cat(x, h) @ W1 + b1) == tanh(x @ W1x + h @ W1h + b1); zero padding
    # keeps padded hidden columns exactly 0 (tanh(0)=0) and padded W1h rows
    # contribute nothing, so results are exact.
    def _pack(w1, b1):
        w1x = jnp.pad(w1[:E, :], ((0, 0), (0, H_pad - H)))
        w1h = jnp.pad(w1[E:, :], ((0, H_pad - H), (0, H_pad - H)))
        b1p = jnp.pad(b1, ((0, H_pad - H),)).reshape(1, H_pad)
        return w1x, w1h, b1p

    w1x_q, w1h_q, b1_qp = _pack(w1_q, b1_q)
    w1x_p, w1h_p, b1_pp = _pack(w1_p, b1_p)
    w1x_all = jnp.stack([w1x_q, w1x_p], axis=0)     # (2, E, H_pad)
    w1h_all = jnp.stack([w1h_q, w1h_p], axis=0)     # (2, H_pad, H_pad)
    b1_all = jnp.stack([b1_qp, b1_pp], axis=0)      # (2, 1, H_pad)
    wmap = jnp.array([0, 1], dtype=jnp.int32)       # stream -> tower index

    # ---------------- kernel ----------------
    def kernel(wmap_ref, x_ref, w1x_ref, w1h_ref, b1_ref, out_ref,
               h_scr, xw_scr):
        c = pl.program_id(1)

        @pl.when(c == 0)
        def _():
            h_scr[...] = jnp.zeros_like(h_scr)

        # Chunk-wide input projection (no recurrence): one fat MXU pass with
        # T_CHUNK*M rows; bias is added once here, not per timestep.
        xw_scr[...] = (
            jnp.dot(x_ref[...], w1x_ref[...],
                    preferred_element_type=jnp.float32)
            + b1_ref[...]
        )

        w1h = w1h_ref[...]   # hoisted: loaded once per chunk

        def step(t, h):
            row = pl.multiple_of(t * M, 8)
            pre = xw_scr[pl.ds(row, M), :] + jnp.dot(
                h, w1h, preferred_element_type=jnp.float32)
            h_new = jnp.tanh(pre)
            if has_tail:   # mask zero-padded tail timesteps (trace-time branch)
                h_new = jnp.where(c * T_CHUNK + t < T, h_new, h)
            return h_new

        h = lax.fori_loop(0, T_CHUNK, step, h_scr[...], unroll=True)
        h_scr[...] = h

        @pl.when(c == pl.num_programs(1) - 1)
        def _():
            out_ref[...] = h.astype(out_ref.dtype)

    cost = pl.CostEstimate(
        flops=2 * 2 * T_pad * M * (E + H_pad) * H_pad,
        transcendentals=2 * T_pad * M * H_pad,
        bytes_accessed=4 * (x_all.size + w1x_all.size + w1h_all.size
                            + b1_all.size + 2 * M * H_pad),
    )

    out = pl.pallas_call(
        kernel,
        out_shape=jax.ShapeDtypeStruct((2, M, H_pad), query_embs.dtype),
        grid_spec=pltpu.PrefetchScalarGridSpec(
            num_scalar_prefetch=1,
            grid=(2, n_chunks),
            in_specs=[
                # A whole time-chunk of tokens per grid step (pipelined).
                pl.BlockSpec((None, T_CHUNK * M, E),
                             lambda s, c, wmap_ref: (s, c, 0)),
                # Tower weights: block index constant over the time axis ->
                # resident in VMEM for a stream's whole sequence.
                # (With large real H on v7x: add pipeline_mode=pl.Buffered(1)
                #  to single-buffer these and set vmem_limit_bytes against
                #  its 64 MiB VMEM; unnecessary at these toy sizes.)
                pl.BlockSpec((None, E, H_pad),
                             lambda s, c, wmap_ref: (wmap_ref[s], 0, 0)),
                pl.BlockSpec((None, H_pad, H_pad),
                             lambda s, c, wmap_ref: (wmap_ref[s], 0, 0)),
                pl.BlockSpec((None, 1, H_pad),
                             lambda s, c, wmap_ref: (wmap_ref[s], 0, 0)),
            ],
            out_specs=pl.BlockSpec((None, M, H_pad),
                                   lambda s, c, wmap_ref: (s, 0, 0)),
            scratch_shapes=[
                pltpu.VMEM((M, H_pad), jnp.float32),             # h carry
                pltpu.VMEM((T_CHUNK * M, H_pad), jnp.float32),   # x-projection
            ],
        ),
        compiler_params=pltpu.CompilerParams(
            dimension_semantics=("parallel", "arbitrary"),
        ),
        cost_estimate=cost,
    )(wmap, x_all, w1x_all, w1h_all, b1_all)

    q_vec = out[0, :B, :H]
    p_pos = out[1, :B, :H]
    p_neg = out[1, B:2 * B, :H]
    return q_vec, p_pos, p_neg


# ----------------------------- pure-JAX reference -----------------------------
def _ref_encode(embs, w1, b1):
    B, T, _ = embs.shape
    H = b1.shape[-1]
    h = jnp.zeros((B, H), dtype=embs.dtype)
    for t in range(T):
        comb = jnp.concatenate([embs[:, t, :], h], axis=-1)
        h = jnp.tanh(comb @ w1 + b1)
    return h


def _ref_forward(q, p, n, w1_q, b1_q, w1_p, b1_p):
    return (_ref_encode(q, w1_q, b1_q),
            _ref_encode(p, w1_p, b1_p),
            _ref_encode(n, w1_p, b1_p))


if __name__ == "__main__":
    key = jax.random.PRNGKey(0)
    B, T, E, H = 2, 8, 16, 32

    ks = jax.random.split(key, 7)
    q_embs = jax.random.normal(ks[0], (B, T, E), jnp.float32)
    p_embs = jax.random.normal(ks[1], (B, T, E), jnp.float32)
    n_embs = jax.random.normal(ks[2], (B, T, E), jnp.float32)

    # nn.Linear-style uniform init (bound = 1/sqrt(fan_in)), deterministic.
    fan1 = E + H
    bound1 = 1.0 / (fan1 ** 0.5)
    w1_q = jax.random.uniform(ks[3], (fan1, H), jnp.float32, -bound1, bound1)
    b1_q = jax.random.uniform(ks[4], (H,), jnp.float32, -bound1, bound1)
    w1_p = jax.random.uniform(ks[5], (fan1, H), jnp.float32, -bound1, bound1)
    b1_p = jax.random.uniform(ks[6], (H,), jnp.float32, -bound1, bound1)
    # (Predictor Linear weights exist in the torch module but its output is
    #  discarded by encode_sequence, so they play no role in forward outputs.)

    q_vec, p_pos, p_neg = jax.jit(two_tower_triplet_rnn)(
        q_embs, p_embs, n_embs, w1_q, b1_q, w1_p, b1_p)
    jax.block_until_ready((q_vec, p_pos, p_neg))

    q_ref, p_ref, n_ref = _ref_forward(q_embs, p_embs, n_embs,
                                       w1_q, b1_q, w1_p, b1_p)
    assert q_vec.shape == (B, H) and p_pos.shape == (B, H) and p_neg.shape == (B, H)
    assert jnp.allclose(q_vec, q_ref, atol=1e-4, rtol=1e-4), \
        float(jnp.abs(q_vec - q_ref).max())
    assert jnp.allclose(p_pos, p_ref, atol=1e-4, rtol=1e-4), \
        float(jnp.abs(p_pos - p_ref).max())
    assert jnp.allclose(p_neg, n_ref, atol=1e-4, rtol=1e-4), \
        float(jnp.abs(p_neg - n_ref).max())

    print("KERNEL_OK")
</pallas_src>

<mosaic_0001>
module attributes {stable_mosaic.version = 11 : i64} {
  func.func @kernel(%arg0: i32, %arg1: i32, %arg2: memref<2xi32, #tpu.memory_space<smem>>, %arg3: memref<1x64x16xf32, #tpu.memory_space<vmem>>, %arg4: memref<1x16x128xf32, #tpu.memory_space<vmem>>, %arg5: memref<1x128x128xf32, #tpu.memory_space<vmem>>, %arg6: memref<1x1x128xf32, #tpu.memory_space<vmem>>, %arg7: memref<1x8x128xf32, #tpu.memory_space<vmem>>, %arg8: memref<8x128xf32, #tpu.memory_space<vmem>>, %arg9: memref<64x128xf32, #tpu.memory_space<vmem>>) attributes {dimension_semantics = [#tpu.dimension_semantics<parallel>, #tpu.dimension_semantics<arbitrary>], iteration_bounds = array<i64: 2, 1>, scalar_prefetch = 1 : i64, scratch_operands = 2 : i64, tpu.core_type = #tpu.core_type<tc>, window_params = [{transform_indices = @transform_0, window_bounds = array<i64: 1, 64, 16>}, {transform_indices = @transform_1, window_bounds = array<i64: 1, 16, 128>}, {transform_indices = @transform_2, window_bounds = array<i64: 1, 128, 128>}, {transform_indices = @transform_3, window_bounds = array<i64: 1, 1, 128>}, {transform_indices = @transform_4, window_bounds = array<i64: 1, 8, 128>}]} {
    %c0_i32 = arith.constant 0 : i32
    %0 = arith.cmpi eq, %arg1, %c0_i32 : i32
    %1 = arith.extui %0 : i1 to i32
    %c0_i32_0 = arith.constant 0 : i32
    %2 = arith.cmpi ne, %1, %c0_i32_0 : i32
    scf.if %2 {
      %cst_45 = arith.constant 0.000000e+00 : f32
      %76 = vector.broadcast %cst_45 : f32 to vector<8x128xf32>
      %c0_46 = arith.constant 0 : index
      %c0_47 = arith.constant 0 : index
      %77 = vector.load %arg8[%c0_46, %c0_47] : memref<8x128xf32, #tpu.memory_space<vmem>>, vector<8x128xf32>
      tpu.vector_store %arg8[%c0_46, %c0_47], %76 {strides = array<i32>} : memref<8x128xf32, #tpu.memory_space<vmem>>, vector<8x128xf32>,
    } else {
    }
    %c0 = arith.constant 0 : index
    %c0_1 = arith.constant 0 : index
    %c0_2 = arith.constant 0 : index
    %3 = vector.load %arg3[%c0, %c0_1, %c0_2] : memref<1x64x16xf32, #tpu.memory_space<vmem>>, vector<1x64x16xf32>
    %4 = vector.shape_cast %3 : vector<1x64x16xf32> to vector<64x16xf32>
    %c0_3 = arith.constant 0 : index
    %c0_4 = arith.constant 0 : index
    %c0_5 = arith.constant 0 : index
    %5 = vector.load %arg4[%c0_3, %c0_4, %c0_5] : memref<1x16x128xf32, #tpu.memory_space<vmem>>, vector<1x16x128xf32>
    %6 = vector.shape_cast %5 : vector<1x16x128xf32> to vector<16x128xf32>
    %cst = arith.constant dense<0.000000e+00> : vector<64x128xf32>
    %7 = tpu.matmul %4, %6, %cst {dimension_numbers = #tpu.dot_dimension_numbers<[1], [0], [0], [1], [0, 0, 1, 1], [], []>} : vector<64x16xf32>, vector<16x128xf32>, vector<64x128xf32> -> vector<64x128xf32>
    %c0_6 = arith.constant 0 : index
    %c0_7 = arith.constant 0 : index
    %c0_8 = arith.constant 0 : index
    %8 = vector.load %arg6[%c0_6, %c0_7, %c0_8] : memref<1x1x128xf32, #tpu.memory_space<vmem>>, vector<1x1x128xf32>
    %9 = vector.shape_cast %8 : vector<1x1x128xf32> to vector<1x128xf32>
    %10 = vector.broadcast %9 : vector<1x128xf32> to vector<64x128xf32>
    %11 = arith.addf %7, %10 : vector<64x128xf32>
    %c0_9 = arith.constant 0 : index
    %c0_10 = arith.constant 0 : index
    %12 = vector.load %arg9[%c0_9, %c0_10] : memref<64x128xf32, #tpu.memory_space<vmem>>, vector<64x128xf32>
    tpu.vector_store %arg9[%c0_9, %c0_10], %11 {strides = array<i32>} : memref<64x128xf32, #tpu.memory_space<vmem>>, vector<64x128xf32>,
    %c0_11 = arith.constant 0 : index
    %c0_12 = arith.constant 0 : index
    %c0_13 = arith.constant 0 : index
    %13 = vector.load %arg5[%c0_11, %c0_12, %c0_13] : memref<1x128x128xf32, #tpu.memory_space<vmem>>, vector<1x128x128xf32>
    %14 = vector.shape_cast %13 : vector<1x128x128xf32> to vector<128x128xf32>
    %c0_14 = arith.constant 0 : index
    %c0_15 = arith.constant 0 : index
    %15 = vector.load %arg8[%c0_14, %c0_15] : memref<8x128xf32, #tpu.memory_space<vmem>>, vector<8x128xf32>
    %c0_i32_16 = arith.constant 0 : i32
    %c8_i32 = arith.constant 8 : i32
    %16 = arith.muli %c0_i32_16, %c8_i32 : i32
    %17 = tpu.assume_multiple %16, 8 : i32
    %18 = arith.index_cast %17 : i32 to index
    %c0_17 = arith.constant 0 : index
    %19 = vector.load %arg9[%18, %c0_17] : memref<64x128xf32, #tpu.memory_space<vmem>>, vector<8x128xf32>
    %cst_18 = arith.constant dense<0.000000e+00> : vector<8x128xf32>
    %20 = tpu.matmul %15, %14, %cst_18 {dimension_numbers = #tpu.dot_dimension_numbers<[1], [0], [0], [1], [0, 0, 1, 1], [], []>} : vector<8x128xf32>, vector<128x128xf32>, vector<8x128xf32> -> vector<8x128xf32>
    %21 = arith.addf %19, %20 : vector<8x128xf32>
    %22 = math.tanh %21 : vector<8x128xf32>
    %c1_i32 = arith.constant 1 : i32
    %c8_i32_19 = arith.constant 8 : i32
    %23 = arith.muli %c1_i32, %c8_i32_19 : i32
    %24 = tpu.assume_multiple %23, 8 : i32
    %25 = arith.index_cast %24 : i32 to index
    %c0_20 = arith.constant 0 : index
    %26 = vector.load %arg9[%25, %c0_20] : memref<64x128xf32, #tpu.memory_space<vmem>>, vector<8x128xf32>
    %cst_21 = arith.constant dense<0.000000e+00> : vector<8x128xf32>
    %27 = tpu.matmul %22, %14, %cst_21 {dimension_numbers = #tpu.dot_dimension_numbers<[1], [0], [0], [1], [0, 0, 1, 1], [], []>} : vector<8x128xf32>, vector<128x128xf32>, vector<8x128xf32> -> vector<8x128xf32>
    %28 = arith.addf %26, %27 : vector<8x128xf32>
    %29 = math.tanh %28 : vector<8x128xf32>
    %c2_i32 = arith.constant 2 : i32
    %c8_i32_22 = arith.constant 8 : i32
    %30 = arith.muli %c2_i32, %c8_i32_22 : i32
    %31 = tpu.assume_multiple %30, 8 : i32
    %32 = arith.index_cast %31 : i32 to index
    %c0_23 = arith.constant 0 : index
    %33 = vector.load %arg9[%32, %c0_23] : memref<64x128xf32, #tpu.memory_space<vmem>>, vector<8x128xf32>
    %cst_24 = arith.constant dense<0.000000e+00> : vector<8x128xf32>
    %34 = tpu.matmul %29, %14, %cst_24 {dimension_numbers = #tpu.dot_dimension_numbers<[1], [0], [0], [1], [0, 0, 1, 1], [], []>} : vector<8x128xf32>, vector<128x128xf32>, vector<8x128xf32> -> vector<8x128xf32>
    %35 = arith.addf %33, %34 : vector<8x128xf32>
    %36 = math.tanh %35 : vector<8x128xf32>
    %c3_i32 = arith.constant 3 : i32
    %c8_i32_25 = arith.constant 8 : i32
    %37 = arith.muli %c3_i32, %c8_i32_25 : i32
    %38 = tpu.assume_multiple %37, 8 : i32
    %39 = arith.index_cast %38 : i32 to index
    %c0_26 = arith.constant 0 : index
    %40 = vector.load %arg9[%39, %c0_26] : memref<64x128xf32, #tpu.memory_space<vmem>>, vector<8x128xf32>
    %cst_27 = arith.constant dense<0.000000e+00> : vector<8x128xf32>
    %41 = tpu.matmul %36, %14, %cst_27 {dimension_numbers = #tpu.dot_dimension_numbers<[1], [0], [0], [1], [0, 0, 1, 1], [], []>} : vector<8x128xf32>, vector<128x128xf32>, vector<8x128xf32> -> vector<8x128xf32>
    %42 = arith.addf %40, %41 : vector<8x128xf32>
    %43 = math.tanh %42 : vector<8x128xf32>
    %c4_i32 = arith.constant 4 : i32
    %c8_i32_28 = arith.constant 8 : i32
    %44 = arith.muli %c4_i32, %c8_i32_28 : i32
    %45 = tpu.assume_multiple %44, 8 : i32
    %46 = arith.index_cast %45 : i32 to index
    %c0_29 = arith.constant 0 : index
    %47 = vector.load %arg9[%46, %c0_29] : memref<64x128xf32, #tpu.memory_space<vmem>>, vector<8x128xf32>
    %cst_30 = arith.constant dense<0.000000e+00> : vector<8x128xf32>
    %48 = tpu.matmul %43, %14, %cst_30 {dimension_numbers = #tpu.dot_dimension_numbers<[1], [0], [0], [1], [0, 0, 1, 1], [], []>} : vector<8x128xf32>, vector<128x128xf32>, vector<8x128xf32> -> vector<8x128xf32>
    %49 = arith.addf %47, %48 : vector<8x128xf32>
    %50 = math.tanh %49 : vector<8x128xf32>
    %c5_i32 = arith.constant 5 : i32
    %c8_i32_31 = arith.constant 8 : i32
    %51 = arith.muli %c5_i32, %c8_i32_31 : i32
    %52 = tpu.assume_multiple %51, 8 : i32
    %53 = arith.index_cast %52 : i32 to index
    %c0_32 = arith.constant 0 : index
    %54 = vector.load %arg9[%53, %c0_32] : memref<64x128xf32, #tpu.memory_space<vmem>>, vector<8x128xf32>
    %cst_33 = arith.constant dense<0.000000e+00> : vector<8x128xf32>
    %55 = tpu.matmul %50, %14, %cst_33 {dimension_numbers = #tpu.dot_dimension_numbers<[1], [0], [0], [1], [0, 0, 1, 1], [], []>} : vector<8x128xf32>, vector<128x128xf32>, vector<8x128xf32> -> vector<8x128xf32>
    %56 = arith.addf %54, %55 : vector<8x128xf32>
    %57 = math.tanh %56 : vector<8x128xf32>
    %c6_i32 = arith.constant 6 : i32
    %c8_i32_34 = arith.constant 8 : i32
    %58 = arith.muli %c6_i32, %c8_i32_34 : i32
    %59 = tpu.assume_multiple %58, 8 : i32
    %60 = arith.index_cast %59 : i32 to index
    %c0_35 = arith.constant 0 : index
    %61 = vector.load %arg9[%60, %c0_35] : memref<64x128xf32, #tpu.memory_space<vmem>>, vector<8x128xf32>
    %cst_36 = arith.constant dense<0.000000e+00> : vector<8x128xf32>
    %62 = tpu.matmul %57, %14, %cst_36 {dimension_numbers = #tpu.dot_dimension_numbers<[1], [0], [0], [1], [0, 0, 1, 1], [], []>} : vector<8x128xf32>, vector<128x128xf32>, vector<8x128xf32> -> vector<8x128xf32>
    %63 = arith.addf %61, %62 : vector<8x128xf32>
    %64 = math.tanh %63 : vector<8x128xf32>
    %c7_i32 = arith.constant 7 : i32
    %c8_i32_37 = arith.constant 8 : i32
    %65 = arith.muli %c7_i32, %c8_i32_37 : i32
    %66 = tpu.assume_multiple %65, 8 : i32
    %67 = arith.index_cast %66 : i32 to index
    %c0_38 = arith.constant 0 : index
    %68 = vector.load %arg9[%67, %c0_38] : memref<64x128xf32, #tpu.memory_space<vmem>>, vector<8x128xf32>
    %cst_39 = arith.constant dense<0.000000e+00> : vector<8x128xf32>
    %69 = tpu.matmul %64, %14, %cst_39 {dimension_numbers = #tpu.dot_dimension_numbers<[1], [0], [0], [1], [0, 0, 1, 1], [], []>} : vector<8x128xf32>, vector<128x128xf32>, vector<8x128xf32> -> vector<8x128xf32>
    %70 = arith.addf %68, %69 : vector<8x128xf32>
    %71 = math.tanh %70 : vector<8x128xf32>
    %c8_i32_40 = arith.constant 8 : i32
    %c0_41 = arith.constant 0 : index
    %c0_42 = arith.constant 0 : index
    %72 = vector.load %arg8[%c0_41, %c0_42] : memref<8x128xf32, #tpu.memory_space<vmem>>, vector<8x128xf32>
    tpu.vector_store %arg8[%c0_41, %c0_42], %71 {strides = array<i32>} : memref<8x128xf32, #tpu.memory_space<vmem>>, vector<8x128xf32>,
    %c0_i32_43 = arith.constant 0 : i32
    %73 = arith.cmpi eq, %arg1, %c0_i32_43 : i32
    %74 = arith.extui %73 : i1 to i32
    %c0_i32_44 = arith.constant 0 : i32
    %75 = arith.cmpi ne, %74, %c0_i32_44 : i32
    scf.if %75 {
      %c0_45 = arith.constant 0 : index
      %c0_46 = arith.constant 0 : index
      %c0_47 = arith.constant 0 : index
      %76 = vector.load %arg7[%c0_45, %c0_46, %c0_47] : memref<1x8x128xf32, #tpu.memory_space<vmem>>, vector<1x8x128xf32>
      %77 = vector.shape_cast %76 : vector<1x8x128xf32> to vector<8x128xf32>
      %78 = vector.shape_cast %71 : vector<8x128xf32> to vector<1x8x128xf32>
      tpu.vector_store %arg7[%c0_45, %c0_46, %c0_47], %78 {strides = array<i32>} : memref<1x8x128xf32, #tpu.memory_space<vmem>>, vector<1x8x128xf32>,
    } else {
    }
    return
  }
  func.func @transform_0(%arg0: i32, %arg1: i32, %arg2: memref<2xi32, #tpu.memory_space<smem>>) -> (i32, i32, i32) {
    %c0_i32 = arith.constant 0 : i32
    %c0_i32_0 = arith.constant 0 : i32
    return %arg0, %arg1, %c0_i32 : i32, i32, i32
  }
  func.func @transform_1(%arg0: i32, %arg1: i32, %arg2: memref<2xi32, #tpu.memory_space<smem>>) -> (i32, i32, i32) {
    %0 = arith.index_cast %arg0 : i32 to index
    %1 = memref.load %arg2[%0] : memref<2xi32, #tpu.memory_space<smem>>
    %c0_i32 = arith.constant 0 : i32
    %c0_i32_0 = arith.constant 0 : i32
    %c0_i32_1 = arith.constant 0 : i32
    return %1, %c0_i32, %c0_i32_0 : i32, i32, i32
  }
  func.func @transform_2(%arg0: i32, %arg1: i32, %arg2: memref<2xi32, #tpu.memory_space<smem>>) -> (i32, i32, i32) {
    %0 = arith.index_cast %arg0 : i32 to index
    %1 = memref.load %arg2[%0] : memref<2xi32, #tpu.memory_space<smem>>
    %c0_i32 = arith.constant 0 : i32
    %c0_i32_0 = arith.constant 0 : i32
    %c0_i32_1 = arith.constant 0 : i32
    return %1, %c0_i32, %c0_i32_0 : i32, i32, i32
  }
  func.func @transform_3(%arg0: i32, %arg1: i32, %arg2: memref<2xi32, #tpu.memory_space<smem>>) -> (i32, i32, i32) {
    %0 = arith.index_cast %arg0 : i32 to index
    %1 = memref.load %arg2[%0] : memref<2xi32, #tpu.memory_space<smem>>
    %c0_i32 = arith.constant 0 : i32
    %c0_i32_0 = arith.constant 0 : i32
    %c0_i32_1 = arith.constant 0 : i32
    return %1, %c0_i32, %c0_i32_0 : i32, i32, i32
  }
  func.func @transform_4(%arg0: i32, %arg1: i32, %arg2: memref<2xi32, #tpu.memory_space<smem>>) -> (i32, i32, i32) {
    %c0_i32 = arith.constant 0 : i32
    %c0_i32_0 = arith.constant 0 : i32
    %c0_i32_1 = arith.constant 0 : i32
    return %arg0, %c0_i32, %c0_i32_0 : i32, i32, i32
  }
}

</mosaic_0001>

<bundles_post_ra>
// kernel: two_tower_triplet_rnn.1
= control target key start
LH: loop header
LB: loop body
LE: loop exit
PB: predicated region body
PF: predicated region fallthrough
CT: control target
= control target key end

     0   :  { %s2234_s0 = inlined_call_operand.vmem [shape: s32[2], index: 0, kind: input, shape index: {}]   ;;  %s2235_s1 = inlined_call_operand.vmem [shape: f32[2,64,16], index: 1, kind: input, shape index: {}]   ;;  %s2236_s2 = inlined_call_operand.vmem [shape: f32[2,16,128], index: 2, kind: input, shape index: {}]   ;;  %s2237_s3 = inlined_call_operand.vmem [shape: f32[2,128,128], index: 3, kind: input, shape index: {}]   ;;  %s2238_s4 = inlined_call_operand.vmem [shape: f32[2,1,128], index: 4, kind: input, shape index: {}]   ;;  %s2239_s5 = inlined_call_operand.vmem [shape: f32[2,8,128], index: 5, kind: output, shape index: {}]  }
   0x1   :  { %s10_s20 = sshll.u32 %s2234_s0, 4  ;;  %s11_s20 = int_to_ptr.vmem [resolvable:$true] %s10_s20 }
   0x2   :  { %s1887_s21 = scalar_lea.vmem %s11_s20, 16  ;;  %p1892_p1 = scmp.lt.s32.totalorder %s11_s20, %s11_s20 }
   0x3   :  { %p1888_p0 = scmp.ne.s32.totalorder %s11_s20, %s1887_s21  ;;  %p1893_p2 = scmp.lt.s32.totalorder %s1887_s21, %s1887_s21 }
   0x5   :  { %p1894_p3 = por %p1893_p2, %p1892_p1 }
   0x7   :  { %p1895_p4 = pnand %p1894_p3, %p1888_p0 }
   0x9   :  { %1898 = shalt.err (!%p1895_p4)  }
   0xa   :  { %s1925_s22 = smov [#allocation5]  }
   0xb   :  { %13 = dma.vmem_to_smem %s11_s20, 16, %s1925_s22, [#allocation4] }
   0xc   :  { %1911 = dma.done.wait [#allocation4], 16 }
   0xd   :  { %1912 = vsyncadd [#allocation4], 4294967280 }
   0xe   :  { %15 = sfence }
   0xf   :  { %s1962_s23 = smov 0   ;;  %s1964_s24 = smov 0  }
  0x10   :  { %s1966_s25 = smov 0  }
  0x11 LB: > { %s33_s0 = sadd.s32 1, %s1919_s24  ;;  %p1183_p5 = scmp.ge.s32.totalorder %s1923_s25, 1  ;;  %s1923_s25 = sphi %s1966_s25, %s21_s25   ;;  %s1919_s24 = sphi %s1964_s24, %s2241_s24   ;;  %s1915_s23 = sphi %s1962_s23, %s2240_s23  }
  0x12   : > { %p35_p6 = scmp.ge.s32.totalorder %s33_s0, 2  ;;  %p228_p7 = scmp.lt.s32.totalorder %s1923_s25, 3 }
  0x14   : > { %s2243_s0 = smov (%p35_p6, %s33_s0), 0  ;;  %p229_p8 = pnand %p1183_p5, %p228_p7 }
  0x15   : > { %s290_s26 = sld [smem:[#allocation5 + %s1915_s23]] (!%p229_p8)  ;;  %v1926_v0 = vmov (!%p229_p8), 0.0|0.0   ;;  %p274_p9 = scmp.lt.s32.totalorder (!%p229_p8), %s1915_s23, 1  ;;  %vm1927_vm0 = vmmov (!%p229_p8), 0   ;;  %v1928_v1 = vmov (!%p229_p8), 0.0   ;;  %vm328_vm1 = vcmask (!%p229_p8), 130048  }
  0x16   : > { %232 = sbr.rel (%p229_p8) target bundleno = 1869 (0x74d), region = 36  ;;  %s283_s27 = sld [smem:[#allocation5 + %s1915_s23]] (!%p229_p8)  ;;  %1651 = vmatprep.subr.bf16.mxu1 (!%p229_p8), %v1926_v0  ;;  %1399 = vmatprep.mubr.msk.f32.mxu1 (!%p229_p8), %vm1927_vm0, %v1928_v1 }
  0x17   : > { %s297_s16 = sld [smem:[#allocation5 + %s1915_s23]] (!%p229_p8) }
  0x1b   : > { %p291_p10 = scmp.lt.s32.totalorder (!%p229_p8), %s290_s26, 1 }
  0x1c   : > { %p284_p11 = scmp.lt.s32.totalorder (!%p229_p8), %s283_s27, 1 }
  0x1d   : > { %s1989_s28 = scalar_select %p274_p9, %s1915_s23, 1 }
  0x1e   : > { %s2245_s26 = smov (!%p291_p10, %s290_s26), 1  ;;  %s2247_s27 = smov (!%p284_p11, %s283_s27), 1 }
  0x1f   : > { %s1202_s29 = sshll.u32 %s1989_s28, 6  ;;  %s1204_s8 = sshll.u32 %s2245_s26, 7 }
  0x20   : > { %s1995_s7 = scalar_lea.vmem %s2235_s1, %s1202_s29  ;;  %s2002_s11 = scalar_lea.vmem %s2237_s3, %s1204_s8 }
  0x21   : > { %v311_v2 = vld [vmem:[%s1995_s7] sm:$0xff]  ;;  %s1203_s12 = sshll.u32 %s2247_s27, 4  ;;  %v467_v4 = vld [vmem:[%s2002_s11 + $0x8] sm:$0xff]  ;;  %v468_v5 = vld [vmem:[%s2002_s11 + $0x10] sm:$0xff]  ;;  %p298_p12 = scmp.lt.s32.totalorder %s297_s16, 1 }
  0x22   : > { %1355 = vmatprep.mubr.msk.f32.mxu0 %vm328_vm1, %v311_v2  ;;  %v466_v3 = vld [vmem:[%s2002_s11] sm:$0xff]  ;;  %v469_v7 = vld [vmem:[%s2002_s11 + $0x18] sm:$0xff]  ;;  %s288_s15 = scalar_lea.vmem %s2236_s2, %s1203_s12  ;;  %v471_v10 = vld [vmem:[%s2002_s11 + $0x28] sm:$0xff]  ;;  %s1190_s20 = sshll.u32 %s1989_s28, 3 }
  0x23   : > { %v2007_v6 = vpack.c.bf16 %v467_v4, %v466_v3  ;;  %v2014_v8 = vpack.c.bf16 %v469_v7, %v468_v5  ;;  %v470_v9 = vld [vmem:[%s2002_s11 + $0x20] sm:$0xff]  ;;  %v320_v12 = vld [vmem:[%s288_s15 + $0x8] sm:$0xff]  ;;  %v472_v15 = vld [vmem:[%s2002_s11 + $0x30] sm:$0xff]  ;;  %s2249_s16 = smov (!%p298_p12, %s297_s16), 1  ;;  %s305_s23 = scalar_lea.vmem %s2239_s5, %s1190_s20 }
  0x24   : > { %v319_v11 = vld [vmem:[%s288_s15] sm:$0xff]  ;;  %v2020_v14 = vpack.c.bf16 %v471_v10, %v470_v9  ;;  %v473_v16 = vld [vmem:[%s2002_s11 + $0x38] sm:$0xff]  ;;  %v312_v17 = vld [vmem:[%s1995_s7 + $0x8] sm:$0xff]  ;;  %s300_s19 = scalar_lea.vmem %s2238_s4, %s2249_s16 }
  0x25   : > { %1653 = vmatpush3.bf16.msra.mxu1 %v2007_v6  ;;  %v1647_v13 = vpack.c.bf16 %v320_v12, %v319_v11  ;;  %v2028_v18 = vpack.c.bf16 %v473_v16, %v472_v15  ;;  %v474_v19 = vld [vmem:[%s2002_s11 + $0x40] sm:$0xff]  ;;  %v475_v20 = vld [vmem:[%s2002_s11 + $0x48] sm:$0xff]  ;;  %v476_v22 = vld [vmem:[%s2002_s11 + $0x50] sm:$0xff] }
  0x26   : > { %1654 = vmatprep.subr.bf16.mxu1 %v1926_v0  ;;  %v2037_v21 = vpack.c.bf16 %v475_v20, %v474_v19  ;;  %v477_v23 = vld [vmem:[%s2002_s11 + $0x58] sm:$0xff]  ;;  %v478_v25 = vld [vmem:[%s2002_s11 + $0x60] sm:$0xff]  ;;  %v479_v26 = vld [vmem:[%s2002_s11 + $0x68] sm:$0xff] }
  0x27   : > { %1648 = vmatprep.subr.bf16.mxu0 %v1647_v13  ;;  %v2045_v24 = vpack.c.bf16 %v477_v23, %v476_v22  ;;  %v2053_v27 = vpack.c.bf16 %v479_v26, %v478_v25  ;;  %v480_v28 = vld [vmem:[%s2002_s11 + $0x70] sm:$0xff]  ;;  %v481_v29 = vld [vmem:[%s2002_s11 + $0x78] sm:$0xff]  ;;  %v315_v33 = vld [vmem:[%s1995_s7 + $0x20] sm:$0xff] }
  0x28   : > { %1650 = vmatpush3.bf16.msra.mxu0 %v1647_v13  ;;  %v2061_v30 = vpack.c.bf16 %v481_v29, %v480_v28  ;;  %v313_v31 = vld [vmem:[%s1995_s7 + $0x10] sm:$0xff]  ;;  %v314_v32 = vld [vmem:[%s1995_s7 + $0x18] sm:$0xff]  ;;  %v316_v34 = vld [vmem:[%s1995_s7 + $0x28] sm:$0xff] }
  0x29   : > { %1656 = vmatpush3.bf16.msra.mxu1 %v2014_v8  ;;  %1675 = vmatprep.subr.bf16.mxu0 %v1926_v0  ;;  %v317_v35 = vld [vmem:[%s1995_s7 + $0x30] sm:$0xff]  ;;  %v318_v36 = vld [vmem:[%s1995_s7 + $0x38] sm:$0xff]  ;;  %v2111_v39 = vld [vmem:[%s300_s19] ss:$0 sm:$0xff] }
  0x2a   : > { %1657 = vmatprep.subr.bf16.mxu1 %v1926_v0 }
  0x2b   : > { %1356 = vmatmul.mubr.msk.f32.vlgmr.msra.gmra.mrb[0].mxu0 %vm328_vm1, %v312_v17 }
  0x2c   : > { %1677 = vmatpush3.bf16.msra.mxu0 %v2007_v6  ;;  %1358 = vmatprep.mubr.msk.f32.mxu0 %vm328_vm1, %v313_v31 }
  0x2d   : > { %1659 = vmatpush3.bf16.msra.mxu1 %v2020_v14  ;;  %1678 = vmatprep.subr.bf16.mxu0 %v1926_v0 }
  0x2e   : > { %1660 = vmatprep.subr.bf16.mxu1 %v1926_v0 }
  0x2f   : > { %1359 = vmatmul.mubr.msk.f32.gmra.mrb[2].mxu0 %vm328_vm1, %v314_v32 }
  0x30   : > { %1680 = vmatpush3.bf16.msra.mxu0 %v2014_v8  ;;  %1361 = vmatprep.mubr.msk.f32.mxu0 %vm328_vm1, %v315_v33 }
  0x31   : > { %1662 = vmatpush3.bf16.msra.mxu1 %v2028_v18  ;;  %1681 = vmatprep.subr.bf16.mxu0 %v1926_v0 }
  0x32   : > { %1663 = vmatprep.subr.bf16.mxu1 %v1926_v0 }
  0x33   : > { %1362 = vmatmul.mubr.msk.f32.gmra.mrb[4].mxu0 %vm328_vm1, %v316_v34 }
  0x34   : > { %1683 = vmatpush3.bf16.msra.mxu0 %v2020_v14  ;;  %1364 = vmatprep.mubr.msk.f32.mxu0 %vm328_vm1, %v317_v35 }
  0x35   : > { %1665 = vmatpush3.bf16.msra.mxu1 %v2037_v21  ;;  %1684 = vmatprep.subr.bf16.mxu0 %v1926_v0 }
  0x36   : > { %1666 = vmatprep.subr.bf16.mxu1 %v1926_v0 }
  0x37   : > { %1365 = vmatmul.mubr.msk.f32.gmra.mrb[6].mxu0 %vm328_vm1, %v318_v36 }
  0x38   : > { %1686 = vmatpush3.bf16.msra.mxu0 %v2028_v18  ;;  %1434 = vmatprep.mubr.msk.f32.mxu0 %vm1927_vm0, %v1928_v1 }
  0x39   : > { %1668 = vmatpush3.bf16.msra.mxu1 %v2045_v24  ;;  %1687 = vmatprep.subr.bf16.mxu0 %v1926_v0 }
  0x3a   : > { %1669 = vmatprep.subr.bf16.mxu1 %v1926_v0 }
  0x3c   : > { %1689 = vmatpush3.bf16.msra.mxu0 %v2037_v21 }
  0x3d   : > { %1671 = vmatpush3.bf16.msra.mxu1 %v2053_v27  ;;  %1690 = vmatprep.subr.bf16.mxu0 %v1926_v0 }
  0x3e   : > { %1672 = vmatprep.subr.bf16.mxu1 %v1926_v0 }
  0x40   : > { %1692 = vmatpush3.bf16.msra.mxu0 %v2045_v24 }
  0x41   : > { %1674 = vmatpush3.bf16.msra.mxu1 %v2061_v30  ;;  %1693 = vmatprep.subr.bf16.mxu0 %v1926_v0 }
  0x42   : > { %1699 = vmatprep.subr.bf16.mxu1 %v1926_v0 }
  0x44   : > { %1400 = vmatmul.mubr.f32.vlgmr.msra.gmra.mrb[0].mxu1 %v1928_v1  ;;  %1695 = vmatpush3.bf16.msra.mxu0 %v2053_v27 }
  0x45   : > { %1701 = vmatpush3.bf16.msra.mxu1 %v2007_v6  ;;  %1469 = vmatprep.mubr.msk.f32.mxu1 %vm1927_vm0, %v1928_v1 }
  0x46   : > { %1702 = vmatprep.subr.bf16.mxu1 %v1926_v0  ;;  %1696 = vmatprep.subr.bf16.mxu0 %v1926_v0 }
  0x48   : > { %1698 = vmatpush3.bf16.msra.mxu0 %v2061_v30 }
  0x49   : > { %1704 = vmatpush3.bf16.msra.mxu1 %v2014_v8  ;;  %1723 = vmatprep.subr.bf16.mxu0 %v1926_v0 }
  0x4a   : > { %1705 = vmatprep.subr.bf16.mxu1 %v1926_v0 }
  0x4d   : > { %1707 = vmatpush3.bf16.msra.mxu1 %v2020_v14 }
  0x4e   : > { %1708 = vmatprep.subr.bf16.mxu1 %v1926_v0 }
  0x51   : > { %1710 = vmatpush3.bf16.msra.mxu1 %v2028_v18 }
  0x52   : > { %1711 = vmatprep.subr.bf16.mxu1 %v1926_v0 }
  0x55   : > { %1713 = vmatpush3.bf16.msra.mxu1 %v2037_v21 }
  0x56   : > { %1714 = vmatprep.subr.bf16.mxu1 %v1926_v0 }
  0x59   : > { %1716 = vmatpush3.bf16.msra.mxu1 %v2045_v24 }
  0x5a   : > { %1717 = vmatprep.subr.bf16.mxu1 %v1926_v0 }
  0x5d   : > { %1719 = vmatpush3.bf16.msra.mxu1 %v2053_v27 }
  0x5e   : > { %1720 = vmatprep.subr.bf16.mxu1 %v1926_v0 }
  0x61   : > { %1722 = vmatpush3.bf16.msra.mxu1 %v2061_v30 }
  0x62   : > { %1747 = vmatprep.subr.bf16.mxu1 %v1926_v0 }
  0xfe   : > { %v1357_v37 = vpop.f32.mrb[0].mxu0 }
  0xff   : > { %v419_v38 = vpop.f32.mrb[1].mxu0  ;;  %v425_v51 = vadd.f32 %v1357_v37, %v2111_v39 }
 0x100   : > { %v420_v40 = vadd.f32 %v2111_v39, %v419_v38 }
 0x102   : > { %v1360_v45 = vpop.f32.mrb[2].mxu0 }
 0x103   : > { %v429_v46 = vpop.f32.mrb[3].mxu0  ;;  %v435_v61 = vadd.f32 %v1360_v45, %v2111_v39 }
 0x104   : > { %v430_v56 = vadd.f32 %v2111_v39, %v429_v46 }
 0x106   : > { %v2132_v47 = vpop.f32.mrb[4].mxu0 }
 0x107   : > { %v2134_v48 = vpop.f32.mrb[5].mxu0 }
 0x108   : > { %v440_v4 = vadd.f32 %v2111_v39, %v2134_v48 }
 0x10a   : > { %v2136_v49 = vpop.f32.mrb[6].mxu0 }
 0x10b   : > { %v2138_v50 = vpop.f32.mrb[7].mxu0  ;;  %v455_v17 = vadd.f32 %v2136_v49, %v2111_v39 }
 0x10c   : > { %v450_v13 = vadd.f32 %v2111_v39, %v2138_v50 }
 0x117   : > { %v550_v41 = vpop.f32.mrb[0].mxu1 }
 0x118   : > { %v554_v42 = vadd.f32 %v550_v41, %v420_v40  ;;  %v1401_v43 = vpop.f32.mrb[1].mxu1 }
 0x11a   : > { %1871 = vtanh.f32 %v554_v42 }
 0x124   : > { %v1872_v44 = vpop.eup %1871 }
 0x125   : > { %1435 = vmatmul.mubr.f32.vlgmr.msra.gmra.mrb[8].mxu0 %v1872_v44 }
 0x126   : > { %1725 = vmatpush3.bf16.msra.mxu0 %v2007_v6  ;;  %1504 = vmatprep.mubr.msk.f32.mxu0 %vm1927_vm0, %v1928_v1 }
 0x127   : > { %1726 = vmatprep.subr.bf16.mxu0 %v1926_v0 }
 0x12a   : > { %1728 = vmatpush3.bf16.msra.mxu0 %v2014_v8 }
 0x12b   : > { %1729 = vmatprep.subr.bf16.mxu0 %v1926_v0 }
 0x12e   : > { %1731 = vmatpush3.bf16.msra.mxu0 %v2020_v14 }
 0x12f   : > { %1732 = vmatprep.subr.bf16.mxu0 %v1926_v0 }
 0x132   : > { %1734 = vmatpush3.bf16.msra.mxu0 %v2028_v18 }
 0x133   : > { %1735 = vmatprep.subr.bf16.mxu0 %v1926_v0 }
 0x136   : > { %1737 = vmatpush3.bf16.msra.mxu0 %v2037_v21 }
 0x137   : > { %1738 = vmatprep.subr.bf16.mxu0 %v1926_v0 }
 0x13a   : > { %1740 = vmatpush3.bf16.msra.mxu0 %v2045_v24 }
 0x13b   : > { %1741 = vmatprep.subr.bf16.mxu0 %v1926_v0 }
 0x13e   : > { %1743 = vmatpush3.bf16.msra.mxu0 %v2053_v27 }
 0x13f   : > { %1744 = vmatprep.subr.bf16.mxu0 %v1926_v0 }
 0x142   : > { %1746 = vmatpush3.bf16.msra.mxu0 %v2061_v30 }
 0x143   : > { %1771 = vmatprep.subr.bf16.mxu0 %v1926_v0 }
 0x1f8   : > { %v624_v52 = vpop.f32.mrb[8].mxu0 }
 0x1f9   : > { %v628_v53 = vadd.f32 %v624_v52, %v425_v51  ;;  %v1436_v54 = vpop.f32.mrb[9].mxu0 }
 0x1fb   : > { %1873 = vtanh.f32 %v628_v53 }
 0x205   : > { %v1874_v55 = vpop.eup %1873 }
 0x206   : > { %1470 = vmatmul.mubr.f32.vlgmr.msra.gmra.mrb[2].mxu1 %v1874_v55 }
 0x207   : > { %1749 = vmatpush3.bf16.msra.mxu1 %v2007_v6  ;;  %1539 = vmatprep.mubr.msk.f32.mxu1 %vm1927_vm0, %v1928_v1 }
 0x208   : > { %1750 = vmatprep.subr.bf16.mxu1 %v1926_v0 }
 0x20b   : > { %1752 = vmatpush3.bf16.msra.mxu1 %v2014_v8 }
 0x20c   : > { %1753 = vmatprep.subr.bf16.mxu1 %v1926_v0 }
 0x20f   : > { %1755 = vmatpush3.bf16.msra.mxu1 %v2020_v14 }
 0x210   : > { %1756 = vmatprep.subr.bf16.mxu1 %v1926_v0 }
 0x213   : > { %1758 = vmatpush3.bf16.msra.mxu1 %v2028_v18 }
 0x214   : > { %1759 = vmatprep.subr.bf16.mxu1 %v1926_v0 }
 0x217   : > { %1761 = vmatpush3.bf16.msra.mxu1 %v2037_v21 }
 0x218   : > { %1762 = vmatprep.subr.bf16.mxu1 %v1926_v0 }
 0x21b   : > { %1764 = vmatpush3.bf16.msra.mxu1 %v2045_v24 }
 0x21c   : > { %1765 = vmatprep.subr.bf16.mxu1 %v1926_v0 }
 0x21f   : > { %1767 = vmatpush3.bf16.msra.mxu1 %v2053_v27 }
 0x220   : > { %1768 = vmatprep.subr.bf16.mxu1 %v1926_v0 }
 0x223   : > { %1770 = vmatpush3.bf16.msra.mxu1 %v2061_v30 }
 0x224   : > { %1795 = vmatprep.subr.bf16.mxu1 %v1926_v0 }
 0x2d9   : > { %v698_v57 = vpop.f32.mrb[2].mxu1 }
 0x2da   : > { %v702_v58 = vadd.f32 %v698_v57, %v430_v56  ;;  %v1471_v59 = vpop.f32.mrb[3].mxu1 }
 0x2dc   : > { %1875 = vtanh.f32 %v702_v58 }
 0x2e6   : > { %v1876_v60 = vpop.eup %1875 }
 0x2e7   : > { %1505 = vmatmul.mubr.f32.vlgmr.msra.gmra.mrb[10].mxu0 %v1876_v60 }
 0x2e8   : > { %1773 = vmatpush3.bf16.msra.mxu0 %v2007_v6  ;;  %1574 = vmatprep.mubr.msk.f32.mxu0 %vm1927_vm0, %v1928_v1 }
 0x2e9   : > { %1774 = vmatprep.subr.bf16.mxu0 %v1926_v0 }
 0x2ec   : > { %1776 = vmatpush3.bf16.msra.mxu0 %v2014_v8 }
 0x2ed   : > { %1777 = vmatprep.subr.bf16.mxu0 %v1926_v0 }
 0x2f0   : > { %1779 = vmatpush3.bf16.msra.mxu0 %v2020_v14 }
 0x2f1   : > { %1780 = vmatprep.subr.bf16.mxu0 %v1926_v0 }
 0x2f4   : > { %1782 = vmatpush3.bf16.msra.mxu0 %v2028_v18 }
 0x2f5   : > { %1783 = vmatprep.subr.bf16.mxu0 %v1926_v0 }
 0x2f8   : > { %1785 = vmatpush3.bf16.msra.mxu0 %v2037_v21 }
 0x2f9   : > { %1786 = vmatprep.subr.bf16.mxu0 %v1926_v0 }
 0x2fc   : > { %1788 = vmatpush3.bf16.msra.mxu0 %v2045_v24 }
 0x2fd   : > { %1789 = vmatprep.subr.bf16.mxu0 %v1926_v0 }
 0x300   : > { %1791 = vmatpush3.bf16.msra.mxu0 %v2053_v27 }
 0x301   : > { %1792 = vmatprep.subr.bf16.mxu0 %v1926_v0 }
 0x304   : > { %1794 = vmatpush3.bf16.msra.mxu0 %v2061_v30 }
 0x305   : > { %1819 = vmatprep.subr.bf16.mxu0 %v1926_v0 }
 0x3ba   : > { %v772_v62 = vpop.f32.mrb[10].mxu0 }
 0x3bb   : > { %v776_v63 = vadd.f32 %v772_v62, %v435_v61  ;;  %v1506_v2 = vpop.f32.mrb[11].mxu0 }
 0x3bd   : > { %1877 = vtanh.f32 %v776_v63 }
 0x3c7   : > { %v1878_v3 = vpop.eup %1877 }
 0x3c8   : > { %1540 = vmatmul.mubr.f32.vlgmr.msra.gmra.mrb[4].mxu1 %v1878_v3 }
 0x3c9   : > { %1797 = vmatpush3.bf16.msra.mxu1 %v2007_v6  ;;  %1609 = vmatprep.mubr.msk.f32.mxu1 %vm1927_vm0, %v1928_v1 }
 0x3ca   : > { %1798 = vmatprep.subr.bf16.mxu1 %v1926_v0 }
 0x3cd   : > { %1800 = vmatpush3.bf16.msra.mxu1 %v2014_v8 }
 0x3ce   : > { %1801 = vmatprep.subr.bf16.mxu1 %v1926_v0 }
 0x3d1   : > { %1803 = vmatpush3.bf16.msra.mxu1 %v2020_v14 }
 0x3d2   : > { %1804 = vmatprep.subr.bf16.mxu1 %v1926_v0 }
 0x3d5   : > { %1806 = vmatpush3.bf16.msra.mxu1 %v2028_v18 }
 0x3d6   : > { %1807 = vmatprep.subr.bf16.mxu1 %v1926_v0 }
 0x3d9   : > { %1809 = vmatpush3.bf16.msra.mxu1 %v2037_v21 }
 0x3da   : > { %1810 = vmatprep.subr.bf16.mxu1 %v1926_v0 }
 0x3dd   : > { %1812 = vmatpush3.bf16.msra.mxu1 %v2045_v24 }
 0x3de   : > { %1813 = vmatprep.subr.bf16.mxu1 %v1926_v0 }
 0x3e1   : > { %1815 = vmatpush3.bf16.msra.mxu1 %v2053_v27 }
 0x3e2   : > { %1816 = vmatprep.subr.bf16.mxu1 %v1926_v0 }
 0x3e5   : > { %1818 = vmatpush3.bf16.msra.mxu1 %v2061_v30 }
 0x49b   : > { %v846_v5 = vpop.f32.mrb[4].mxu1 }
 0x49c   : > { %v850_v7 = vadd.f32 %v846_v5, %v440_v4  ;;  %v1541_v9 = vpop.f32.mrb[5].mxu1 }
 0x49e   : > { %1879 = vtanh.f32 %v850_v7 }
 0x4a8   : > { %v1880_v10 = vpop.eup %1879 }
 0x4a9   : > { %1575 = vmatmul.mubr.f32.vlgmr.msra.gmra.mrb[12].mxu0 %v1880_v10 }
 0x4aa   : > { %1821 = vmatpush3.bf16.msra.mxu0 %v2007_v6  ;;  %1644 = vmatprep.mubr.msk.f32.mxu0 %vm1927_vm0, %v1928_v1  ;;  %v445_v1 = vadd.f32 %v2132_v47, %v2111_v39 }
 0x4ab   : > { %1822 = vmatprep.subr.bf16.mxu0 %v1926_v0 }
 0x4ae   : > { %1824 = vmatpush3.bf16.msra.mxu0 %v2014_v8 }
 0x4af   : > { %1825 = vmatprep.subr.bf16.mxu0 %v1926_v0 }
 0x4b2   : > { %1827 = vmatpush3.bf16.msra.mxu0 %v2020_v14 }
 0x4b3   : > { %1828 = vmatprep.subr.bf16.mxu0 %v1926_v0 }
 0x4b6   : > { %1830 = vmatpush3.bf16.msra.mxu0 %v2028_v18 }
 0x4b7   : > { %1831 = vmatprep.subr.bf16.mxu0 %v1926_v0 }
 0x4ba   : > { %1833 = vmatpush3.bf16.msra.mxu0 %v2037_v21 }
 0x4bb   : > { %1834 = vmatprep.subr.bf16.mxu0 %v1926_v0 }
 0x4be   : > { %1836 = vmatpush3.bf16.msra.mxu0 %v2045_v24 }
 0x4bf   : > { %1837 = vmatprep.subr.bf16.mxu0 %v1926_v0 }
 0x4c2   : > { %1839 = vmatpush3.bf16.msra.mxu0 %v2053_v27 }
 0x4c3   : > { %1840 = vmatprep.subr.bf16.mxu0 %v1926_v0 }
 0x4c6   : > { %1842 = vmatpush3.bf16.msra.mxu0 %v2061_v30 }
 0x57c   : > { %v920_v6 = vpop.f32.mrb[12].mxu0 }
 0x57d   : > { %v924_v8 = vadd.f32 %v920_v6, %v445_v1  ;;  %v1576_v11 = vpop.f32.mrb[13].mxu0 }
 0x57f   : > { %1881 = vtanh.f32 %v924_v8 }
 0x589   : > { %v1882_v12 = vpop.eup %1881 }
 0x58a   : > { %1610 = vmatmul.mubr.f32.vlgmr.msra.gmra.mrb[6].mxu1 %v1882_v12 }
 0x65d   : > { %v994_v14 = vpop.f32.mrb[6].mxu1 }
 0x65e   : > { %v998_v15 = vadd.f32 %v994_v14, %v450_v13  ;;  %v1611_v16 = vpop.f32.mrb[7].mxu1 }
 0x660   : > { %1883 = vtanh.f32 %v998_v15 }
 0x66a   : > { %v1884_v0 = vpop.eup %1883 }
 0x66b   : > { %1645 = vmatmul.mubr.f32.vlgmr.msra.gmra.mrb[14].mxu0 %v1884_v0 }
 0x73e   : > { %v1068_v18 = vpop.f32.mrb[14].mxu0 }
 0x73f   : > { %v1072_v19 = vadd.f32 %v1068_v18, %v455_v17  ;;  %v1646_v20 = vpop.f32.mrb[15].mxu0 }
 0x741   : > { %1885 = vtanh.f32 %v1072_v19 }
 0x74b   : > { %v1886_v21 = vpop.eup %1885 }
 0x74c   : > { %1078 = vst [vmem:[%s305_s23] sm:$0xff] %v1886_v21 }
 0x74d PF: > { %s21_s25 = sadd.s32 1, %s1923_s25   ;;  %s2240_s23 = smov %s1919_s24 }
 0x74e   : > { %p18_p13 = scmp.ge.s32.totalorder %s21_s25, 4   ;;  %s2241_s24 = smov %s2243_s0 }
 0x750   :  { %20 = sbr.rel (!%p18_p13) target bundleno = 17 (0x11), region = 90 }

</bundles_post_ra>
